<compile_context>
chip_gen: v6e
topology: v6e:2x2x1
jax: 0.10.0
libtpu: 0.0.40
codegen_flags: <defaults>
</compile_context>

<pallas_src>
import functools

import jax
import jax.numpy as jnp
from jax import lax
from jax.experimental import pallas as pl
from jax.experimental.pallas import tpu as pltpu


def _round_up(x, m):
    return (x + m - 1) // m * m


def _vmem_capacity_bytes():
    try:
        return int(pltpu.get_tpu_info().vmem_capacity_bytes)
    except Exception:
        return 64 * 2**20  # conservative (v7x per-core VMEM)


def _ffn_kernel(x_ref, w1_ref, b1_ref, w2_ref, b2_ref, g_ref, bt_ref, mask_ref,
                o_ref, *, eps, d_in, hid_chunk, n_hid_chunks, need_mask,
                cast_bf16):
    x = x_ref[...]

    # Matmul operands in MXU-friendly dtype. `cast_bf16` is an opt-in
    # precision tradeoff (f32 inputs -> bf16 MXU passes, f32 accumulation).
    xm = x.astype(jnp.bfloat16) if cast_bf16 else x

    # Hidden dim in static chunks; weights are pre-transposed in the wrapper
    # so both matmuls are plain (M,K)x(K,N) -> the MXU is the only compute
    # consumer in the steady state (no in-kernel weight relayout).
    y = None
    for c in range(n_hid_chunks):          # static trip count, static slices
        lo = c * hid_chunk
        hi = lo + hid_chunk
        h = jnp.dot(xm, w1_ref[:, lo:hi], preferred_element_type=jnp.float32)
        h = jnp.maximum(h + b1_ref[:, lo:hi].astype(jnp.float32), 0.0)
        if cast_bf16:
            h = h.astype(jnp.bfloat16)
        elif w2_ref.dtype != jnp.float32:
            # bf16 weights -> bf16 MXU path (documented mixed precision).
            h = h.astype(w2_ref.dtype)
        p = jnp.dot(h, w2_ref[lo:hi, :], preferred_element_type=jnp.float32)
        y = p if y is None else y + p
    y = y + b2_ref[...].astype(jnp.float32)

    # TODO(synk): training-mode dropout (p=0.1) not implemented in-kernel
    # (eval-mode identity, matching module.eval()).

    # Residual + LayerNorm over the *real* feature width d_in. Padded feature
    # columns of z are exactly zero; the precomputed 0/1 mask keeps them out
    # of the variance (skipped when there is no feature padding).
    z = y + x.astype(jnp.float32)
    inv_d = 1.0 / d_in
    mean = jnp.sum(z, axis=-1, keepdims=True) * inv_d
    zc = z - mean
    zc_sq = zc * mask_ref[...] if need_mask else zc
    var = jnp.sum(zc_sq * zc_sq, axis=-1, keepdims=True) * inv_d
    zn = zc * lax.rsqrt(var + eps)
    out = zn * g_ref[...].astype(jnp.float32) + bt_ref[...].astype(jnp.float32)
    o_ref[...] = out.astype(o_ref.dtype)


def positionwise_feed_forward(x, w1, b1, w2, b2, gamma, beta, *,
                              eps=1e-5, tile_rows=None, use_bf16_matmul=False):
    """x: (B, L, d_in).
    w1: (d_hid, d_in)  (Conv1d weight (d_hid, d_in, 1) squeezed), b1: (d_hid,)
    w2: (d_in, d_hid)  (Conv1d weight (d_in, d_hid, 1) squeezed), b2: (d_in,)
    gamma/beta: (d_in,) LayerNorm affine parameters."""
    B, L, d_in = x.shape
    d_hid = w1.shape[0]
    rows = B * L

    # ---- feature-dim padding to lane width (exact with zero padding) ----
    d_in_p = _round_up(d_in, 128)
    d_hid_p = _round_up(d_hid, 128)

    # ---- hidden-dim chunk size (static); prefer multiples of 256 ----
    hid_chunk = d_hid_p
    if d_hid_p > 512:
        for c in (512, 256, 128):
            if d_hid_p % c == 0:
                hid_chunk = c
                break
    n_hid_chunks = d_hid_p // hid_chunk

    in_bytes = jnp.dtype(x.dtype).itemsize
    w_bytes = jnp.dtype(w1.dtype).itemsize

    # Sub-32-bit dtypes pack along sublanes -> row tiles must be a multiple
    # of the packed sublane count (8 f32, 16 bf16, 32 int8/fp8).
    row_align = 8 if in_bytes >= 4 else (16 if in_bytes == 2 else 32)

    # Grid-invariant constants are single-buffered via pl.Buffered(1) when
    # available -> count them once in the per-step VMEM estimate.
    single_buffer_consts = hasattr(pl, "Buffered")
    const_mult = 1 if single_buffer_consts else 2

    def step_vmem(tile):
        io = 2 * tile * d_in_p * in_bytes * 2                  # x + out, 2x buffered
        consts = const_mult * (2 * d_in_p * d_hid_p * w_bytes  # W1^T + W2^T
                               + (d_hid_p + 3 * d_in_p) * w_bytes
                               + d_in_p * 4)                   # pad mask (f32)
        interm = tile * hid_chunk * 4 + 3 * tile * d_in_p * 4  # f32 temporaries
        return io + consts + interm

    cap = _vmem_capacity_bytes()
    budget = int(0.7 * cap)
    if tile_rows is None:
        # 512-row tiles amortize the ~0.35us per-grid-step overhead and the
        # LayerNorm epilogue; ~2 grid steps for small inputs so the pipeline
        # and megacore still have work. Halve only under real VMEM pressure.
        if rows >= 1024:
            tile_rows = 512
        else:
            tile_rows = max(row_align, _round_up(pl.cdiv(rows, 2), row_align))
        while tile_rows > row_align and step_vmem(tile_rows) > budget:
            tile_rows = max(row_align, _round_up(tile_rows // 2, row_align))
    tile_rows = _round_up(tile_rows, row_align)

    rows_p = _round_up(rows, tile_rows)
    grid = (rows_p // tile_rows,)

    # ---- padded / pre-transposed operands (one-time XLA cost) ----
    x2d = x.reshape(rows, d_in)
    if rows_p != rows or d_in_p != d_in:
        x2d = jnp.pad(x2d, ((0, rows_p - rows), (0, d_in_p - d_in)))

    def pad2(a, r, c):
        pr, pc = r - a.shape[0], c - a.shape[1]
        return jnp.pad(a, ((0, pr), (0, pc))) if (pr or pc) else a

    w1_t = pad2(w1.T, d_in_p, d_hid_p)     # (d_in_p, d_hid_p): standard K-major
    w2_t = pad2(w2.T, d_hid_p, d_in_p)     # (d_hid_p, d_in_p)
    b1_p = pad2(b1.reshape(1, d_hid), 1, d_hid_p)
    b2_p = pad2(b2.reshape(1, d_in), 1, d_in_p)
    g_p = pad2(gamma.reshape(1, d_in), 1, d_in_p)
    bt_p = pad2(beta.reshape(1, d_in), 1, d_in_p)
    need_mask = d_in_p != d_in
    mask = (jnp.arange(d_in_p) < d_in).astype(jnp.float32).reshape(1, d_in_p)

    vmem_limit = int(min(0.95 * cap, max(32 * 2**20, 1.3 * step_vmem(tile_rows))))

    kernel = functools.partial(
        _ffn_kernel, eps=eps, d_in=d_in, hid_chunk=hid_chunk,
        n_hid_chunks=n_hid_chunks, need_mask=need_mask,
        cast_bf16=bool(use_bf16_matmul) and jnp.dtype(x.dtype) == jnp.float32)

    def run(use_single_buffer):
        def const_spec(shape):
            if use_single_buffer:
                return pl.BlockSpec(shape, lambda i: (0, 0),
                                    pipeline_mode=pl.Buffered(1))
            return pl.BlockSpec(shape, lambda i: (0, 0))

        return pl.pallas_call(
            kernel,
            out_shape=jax.ShapeDtypeStruct((rows_p, d_in_p), x.dtype),
            grid_spec=pltpu.PrefetchScalarGridSpec(
                num_scalar_prefetch=0,
                grid=grid,
                in_specs=[
                    pl.BlockSpec((tile_rows, d_in_p), lambda i: (i, 0)),  # x tile
                    const_spec((d_in_p, d_hid_p)),   # W1^T
                    const_spec((1, d_hid_p)),        # b1
                    const_spec((d_hid_p, d_in_p)),   # W2^T
                    const_spec((1, d_in_p)),         # b2
                    const_spec((1, d_in_p)),         # gamma
                    const_spec((1, d_in_p)),         # beta
                    const_spec((1, d_in_p)),         # pad mask
                ],
                out_specs=pl.BlockSpec((tile_rows, d_in_p), lambda i: (i, 0)),
            ),
            compiler_params=pltpu.CompilerParams(
                dimension_semantics=("parallel",),
                vmem_limit_bytes=vmem_limit),
        )(x2d, w1_t, b1_p, w2_t, b2_p, g_p, bt_p, mask)

    if single_buffer_consts:
        try:
            out2d = run(True)    # single-buffer the grid-invariant constants
        except (TypeError, ValueError, NotImplementedError,
                pltpu.LoweringException):
            # Narrow fallback: this jax build rejects pipeline_mode=Buffered(1).
            out2d = run(False)
    else:
        out2d = run(False)

    out2d = out2d[:rows, :d_in]
    return out2d.reshape(B, L, d_in)


def _reference(x, w1, b1, w2, b2, gamma, beta, eps=1e-5):
    # Pure-JAX reference mirroring the PyTorch forward (eval mode).
    xf = x.astype(jnp.float32)
    h = jnp.maximum(jnp.einsum('bld,hd->blh', xf, w1) + b1, 0.0)
    y = jnp.einsum('blh,dh->bld', h, w2) + b2
    z = y + xf
    mean = jnp.mean(z, axis=-1, keepdims=True)
    var = jnp.mean((z - mean) ** 2, axis=-1, keepdims=True)
    return ((z - mean) * jax.lax.rsqrt(var + eps)) * gamma + beta


if __name__ == "__main__":
    key = jax.random.PRNGKey(0)
    B, L, d_in, d_hid = 2, 8, 32, 64

    kx, k1, k2, k3, k4 = jax.random.split(key, 5)
    x = jax.random.normal(kx, (B, L, d_in), dtype=jnp.float32)

    # Conv1d weights squeezed: (out, in, 1) -> (out, in)
    w1 = jax.random.normal(k1, (d_hid, d_in), jnp.float32) * (1.0 / jnp.sqrt(d_in))
    b1 = jax.random.normal(k2, (d_hid,), jnp.float32) * 0.02
    w2 = jax.random.normal(k3, (d_in, d_hid), jnp.float32) * (1.0 / jnp.sqrt(d_hid))
    b2 = jax.random.normal(k4, (d_in,), jnp.float32) * 0.02
    gamma = jnp.ones((d_in,), jnp.float32)
    beta = jnp.zeros((d_in,), jnp.float32)

    out = positionwise_feed_forward(x, w1, b1, w2, b2, gamma, beta)
    out = jax.block_until_ready(out)

    ref = _reference(x, w1, b1, w2, b2, gamma, beta)
    assert out.shape == (B, L, d_in)
    assert not bool(jnp.any(jnp.isnan(out))), "FFN output has NaN"
    assert jnp.allclose(out, ref, atol=1e-5, rtol=1e-5), "mismatch vs reference"

    print("KERNEL_OK")
</pallas_src>

<mosaic_0001>
module attributes {stable_mosaic.version = 11 : i64} {
  func.func @_ffn_kernel(%arg0: i32, %arg1: memref<8x128xf32, #tpu.memory_space<vmem>>, %arg2: memref<128x128xf32, #tpu.memory_space<vmem>>, %arg3: memref<1x128xf32, #tpu.memory_space<vmem>>, %arg4: memref<128x128xf32, #tpu.memory_space<vmem>>, %arg5: memref<1x128xf32, #tpu.memory_space<vmem>>, %arg6: memref<1x128xf32, #tpu.memory_space<vmem>>, %arg7: memref<1x128xf32, #tpu.memory_space<vmem>>, %arg8: memref<1x128xf32, #tpu.memory_space<vmem>>, %arg9: memref<8x128xf32, #tpu.memory_space<vmem>>) attributes {dimension_semantics = [#tpu.dimension_semantics<parallel>], iteration_bounds = array<i64: 2>, scalar_prefetch = 0 : i64, scratch_operands = 0 : i64, tpu.core_type = #tpu.core_type<tc>, window_params = [{transform_indices = @transform_0, window_bounds = array<i64: 8, 128>}, {pipeline_mode = #tpu.pipeline_mode<synchronous>, transform_indices = @transform_1, window_bounds = array<i64: 128, 128>}, {pipeline_mode = #tpu.pipeline_mode<synchronous>, transform_indices = @transform_2, window_bounds = array<i64: 1, 128>}, {pipeline_mode = #tpu.pipeline_mode<synchronous>, transform_indices = @transform_3, window_bounds = array<i64: 128, 128>}, {pipeline_mode = #tpu.pipeline_mode<synchronous>, transform_indices = @transform_4, window_bounds = array<i64: 1, 128>}, {pipeline_mode = #tpu.pipeline_mode<synchronous>, transform_indices = @transform_5, window_bounds = array<i64: 1, 128>}, {pipeline_mode = #tpu.pipeline_mode<synchronous>, transform_indices = @transform_6, window_bounds = array<i64: 1, 128>}, {pipeline_mode = #tpu.pipeline_mode<synchronous>, transform_indices = @transform_7, window_bounds = array<i64: 1, 128>}, {transform_indices = @transform_8, window_bounds = array<i64: 8, 128>}]} {
    %c0 = arith.constant 0 : index
    %c0_0 = arith.constant 0 : index
    %0 = vector.load %arg1[%c0, %c0_0] : memref<8x128xf32, #tpu.memory_space<vmem>>, vector<8x128xf32>
    %c0_1 = arith.constant 0 : index
    %c0_2 = arith.constant 0 : index
    %1 = vector.load %arg2[%c0_1, %c0_2] : memref<128x128xf32, #tpu.memory_space<vmem>>, vector<128x128xf32>
    %cst = arith.constant dense<0.000000e+00> : vector<8x128xf32>
    %2 = tpu.matmul %0, %1, %cst {dimension_numbers = #tpu.dot_dimension_numbers<[1], [0], [0], [1], [0, 0, 1, 1], [], []>} : vector<8x128xf32>, vector<128x128xf32>, vector<8x128xf32> -> vector<8x128xf32>
    %c0_3 = arith.constant 0 : index
    %c0_4 = arith.constant 0 : index
    %3 = vector.load %arg3[%c0_3, %c0_4] : memref<1x128xf32, #tpu.memory_space<vmem>>, vector<1x128xf32>
    %4 = vector.broadcast %3 : vector<1x128xf32> to vector<8x128xf32>
    %5 = arith.addf %2, %4 : vector<8x128xf32>
    %cst_5 = arith.constant 0.000000e+00 : f32
    %6 = vector.broadcast %cst_5 : f32 to vector<8x128xf32>
    %7 = arith.maximumf %5, %6 : vector<8x128xf32>
    %c0_6 = arith.constant 0 : index
    %c0_7 = arith.constant 0 : index
    %8 = vector.load %arg4[%c0_6, %c0_7] : memref<128x128xf32, #tpu.memory_space<vmem>>, vector<128x128xf32>
    %cst_8 = arith.constant dense<0.000000e+00> : vector<8x128xf32>
    %9 = tpu.matmul %7, %8, %cst_8 {dimension_numbers = #tpu.dot_dimension_numbers<[1], [0], [0], [1], [0, 0, 1, 1], [], []>} : vector<8x128xf32>, vector<128x128xf32>, vector<8x128xf32> -> vector<8x128xf32>
    %c0_9 = arith.constant 0 : index
    %c0_10 = arith.constant 0 : index
    %10 = vector.load %arg5[%c0_9, %c0_10] : memref<1x128xf32, #tpu.memory_space<vmem>>, vector<1x128xf32>
    %11 = vector.broadcast %10 : vector<1x128xf32> to vector<8x128xf32>
    %12 = arith.addf %9, %11 : vector<8x128xf32>
    %13 = arith.addf %12, %0 : vector<8x128xf32>
    %cst_11 = arith.constant dense<0.000000e+00> : vector<8xf32>
    %14 = vector.multi_reduction <add>, %13, %cst_11 [1] : vector<8x128xf32> to vector<8xf32>
    %15 = vector.shape_cast %14 : vector<8xf32> to vector<8x1xf32>
    %cst_12 = arith.constant 3.125000e-02 : f32
    %16 = vector.broadcast %cst_12 : f32 to vector<8x1xf32>
    %17 = arith.mulf %15, %16 : vector<8x1xf32>
    %18 = vector.broadcast %17 : vector<8x1xf32> to vector<8x128xf32>
    %19 = arith.subf %13, %18 : vector<8x128xf32>
    %c0_13 = arith.constant 0 : index
    %c0_14 = arith.constant 0 : index
    %20 = vector.load %arg8[%c0_13, %c0_14] : memref<1x128xf32, #tpu.memory_space<vmem>>, vector<1x128xf32>
    %21 = vector.broadcast %20 : vector<1x128xf32> to vector<8x128xf32>
    %22 = arith.mulf %19, %21 : vector<8x128xf32>
    %23 = arith.mulf %22, %22 : vector<8x128xf32>
    %cst_15 = arith.constant dense<0.000000e+00> : vector<8xf32>
    %24 = vector.multi_reduction <add>, %23, %cst_15 [1] : vector<8x128xf32> to vector<8xf32>
    %25 = vector.shape_cast %24 : vector<8xf32> to vector<8x1xf32>
    %cst_16 = arith.constant 3.125000e-02 : f32
    %26 = vector.broadcast %cst_16 : f32 to vector<8x1xf32>
    %27 = arith.mulf %25, %26 : vector<8x1xf32>
    %cst_17 = arith.constant 9.99999974E-6 : f32
    %28 = vector.broadcast %cst_17 : f32 to vector<8x1xf32>
    %29 = arith.addf %27, %28 : vector<8x1xf32>
    %30 = math.rsqrt %29 : vector<8x1xf32>
    %31 = vector.broadcast %30 : vector<8x1xf32> to vector<8x128xf32>
    %32 = arith.mulf %19, %31 : vector<8x128xf32>
    %c0_18 = arith.constant 0 : index
    %c0_19 = arith.constant 0 : index
    %33 = vector.load %arg6[%c0_18, %c0_19] : memref<1x128xf32, #tpu.memory_space<vmem>>, vector<1x128xf32>
    %34 = vector.broadcast %33 : vector<1x128xf32> to vector<8x128xf32>
    %35 = arith.mulf %32, %34 : vector<8x128xf32>
    %c0_20 = arith.constant 0 : index
    %c0_21 = arith.constant 0 : index
    %36 = vector.load %arg7[%c0_20, %c0_21] : memref<1x128xf32, #tpu.memory_space<vmem>>, vector<1x128xf32>
    %37 = vector.broadcast %36 : vector<1x128xf32> to vector<8x128xf32>
    %38 = arith.addf %35, %37 : vector<8x128xf32>
    %c0_22 = arith.constant 0 : index
    %c0_23 = arith.constant 0 : index
    %39 = vector.load %arg9[%c0_22, %c0_23] : memref<8x128xf32, #tpu.memory_space<vmem>>, vector<8x128xf32>
    tpu.vector_store %arg9[%c0_22, %c0_23], %38 {strides = array<i32>} : memref<8x128xf32, #tpu.memory_space<vmem>>, vector<8x128xf32>,
    return
  }
  func.func @transform_0(%arg0: i32) -> (i32, i32) {
    %c0_i32 = arith.constant 0 : i32
    %c0_i32_0 = arith.constant 0 : i32
    return %arg0, %c0_i32 : i32, i32
  }
  func.func @transform_1(%arg0: i32) -> (i32, i32) {
    %c0_i32 = arith.constant 0 : i32
    %c0_i32_0 = arith.constant 0 : i32
    %c0_i32_1 = arith.constant 0 : i32
    return %c0_i32, %c0_i32_0 : i32, i32
  }
  func.func @transform_2(%arg0: i32) -> (i32, i32) {
    %c0_i32 = arith.constant 0 : i32
    %c0_i32_0 = arith.constant 0 : i32
    %c0_i32_1 = arith.constant 0 : i32
    return %c0_i32, %c0_i32_0 : i32, i32
  }
  func.func @transform_3(%arg0: i32) -> (i32, i32) {
    %c0_i32 = arith.constant 0 : i32
    %c0_i32_0 = arith.constant 0 : i32
    %c0_i32_1 = arith.constant 0 : i32
    return %c0_i32, %c0_i32_0 : i32, i32
  }
  func.func @transform_4(%arg0: i32) -> (i32, i32) {
    %c0_i32 = arith.constant 0 : i32
    %c0_i32_0 = arith.constant 0 : i32
    %c0_i32_1 = arith.constant 0 : i32
    return %c0_i32, %c0_i32_0 : i32, i32
  }
  func.func @transform_5(%arg0: i32) -> (i32, i32) {
    %c0_i32 = arith.constant 0 : i32
    %c0_i32_0 = arith.constant 0 : i32
    %c0_i32_1 = arith.constant 0 : i32
    return %c0_i32, %c0_i32_0 : i32, i32
  }
  func.func @transform_6(%arg0: i32) -> (i32, i32) {
    %c0_i32 = arith.constant 0 : i32
    %c0_i32_0 = arith.constant 0 : i32
    %c0_i32_1 = arith.constant 0 : i32
    return %c0_i32, %c0_i32_0 : i32, i32
  }
  func.func @transform_7(%arg0: i32) -> (i32, i32) {
    %c0_i32 = arith.constant 0 : i32
    %c0_i32_0 = arith.constant 0 : i32
    %c0_i32_1 = arith.constant 0 : i32
    return %c0_i32, %c0_i32_0 : i32, i32
  }
  func.func @transform_8(%arg0: i32) -> (i32, i32) {
    %c0_i32 = arith.constant 0 : i32
    %c0_i32_0 = arith.constant 0 : i32
    return %arg0, %c0_i32 : i32, i32
  }
}

</mosaic_0001>

<bundles_post_ra>
// kernel: tpu_custom_call.1
= control target key start
LH: loop header
LB: loop body
LE: loop exit
PB: predicated region body
PF: predicated region fallthrough
CT: control target
= control target key end

     0   :  { %s1300_s0 = inlined_call_operand.hbm [shape: f32[16,128], index: 0, kind: input, shape index: {}]   ;;  %s1301_s1 = inlined_call_operand.hbm [shape: f32[128,128], index: 1, kind: input, shape index: {}]   ;;  %s1302_s2 = inlined_call_operand.vmem [shape: f32[1,128], index: 2, kind: input, shape index: {}]   ;;  %s1303_s3 = inlined_call_operand.hbm [shape: f32[128,128], index: 3, kind: input, shape index: {}]   ;;  %s1304_s4 = inlined_call_operand.vmem [shape: f32[1,128], index: 4, kind: input, shape index: {}]   ;;  %s1305_s5 = inlined_call_operand.vmem [shape: f32[1,128], index: 5, kind: input, shape index: {}]   ;;  %s1306_s6 = inlined_call_operand.vmem [shape: f32[1,128], index: 6, kind: input, shape index: {}]   ;;  %s1307_s7 = inlined_call_operand.vmem [shape: f32[1,128], index: 7, kind: input, shape index: {}]   ;;  %s1308_s8 = inlined_call_operand.hbm [shape: f32[16,128], index: 8, kind: output, shape index: {}]  }
   0x1   :  { %1313 = sst [smem:[#allocation13_spill]] %s1301_s1 }
   0x2   :  { %1314 = sst [smem:[#allocation14_spill]] %s1303_s3 }
   0x3   :  { %13 = vsyncpa [#allocation3], 0 }
   0x4   :  { %15 = vsyncpa [#allocation3 + $0x1], 0 }
   0x5   :  { %16 = vsyncpa [#allocation6], 0 }
   0x6   :  { %17 = vsyncpa [#allocation4], 0 }
   0x7   :  { %19 = vsyncpa [#allocation4 + $0x1], 0  ;;  %s1079_s27 = smov 0   ;;  %s1081_s28 = smov 0  }
   0x8   :  { %s1083_s29 = smov 0   ;;  %s1085_s30 = smov 0  }
   0x9 LB: > { %s1100_s9 = sadd.s32 4294967295, %s1024_s30   ;;  %s678_s10 = sadd.s32 4294967294, %s1024_s30   ;;  %s1024_s30 = sphi %s1085_s30, %s1336_s30   ;;  %s1020_s29 = sphi %s1083_s29, %s1335_s29   ;;  %s1016_s28 = sphi %s1081_s28, %s1334_s28   ;;  %s1012_s27 = sphi %s1079_s27, %s1333_s27  }
   0xa   : > { %p45_p0 = scmp.ne.s32.totalorder %s1016_s28, %s1012_s27  ;;  %p1309_p1 = scmp.eq.s32.totalorder %s1100_s9, 0 }
   0xb   : > { %p222_p3 = scmp.eq.s32.totalorder %s678_s10, 1  ;;  %p679_p5 = scmp.ge.s32.totalorder %s1024_s30, 1 }
   0xc   : > { %p1109_p4 = por %p1309_p1, %p45_p0  ;;  %p229_p7 = scmp.lt.s32.totalorder %s1024_s30, 3 }
   0xd   : > { %p1114_p6 = por %p222_p3, %p45_p0  ;;  %s1026_s14 = smov [#allocation5]  }
   0xe   : > { %s1315_s11 = scalar_select %p1109_p4, 1, 0 }
   0xf   : > { %s1316_s12 = scalar_select %p1114_p6, 1, 0 }
  0x10   : > { %p1119_p8 = pnand %p679_p5, %p229_p7  ;;  %s241_s15 = sshll.u32 %s1026_s14, 4  ;;  %s242_s15 = int_to_ptr.vmem [resolvable:$true] %s241_s15 }
  0x11   : > { %s1027_s17 = smov [#allocation7]   ;;  %s887_s19 = scalar_lea.vmem %s242_s15, 2048 }
  0x12   : > { %s1317_s13 = scalar_select %p1119_p8, 1, 0 }
  0x13   : > { %p815_p9 = pneg %p1119_p8  ;;  %s257_s18 = sshll.u32 %s1027_s17, 4  ;;  %s258_s18 = int_to_ptr.vmem [resolvable:$true] %s257_s18 }
  0x14   : > { %p888_p13 = scmp.ne.s32.totalorder %s242_s15, %s887_s19  ;;  %p895_p5 = scmp.lt.s32.totalorder %s242_s15, %s242_s15 }
  0x15   : > { %p1128_p11 = pnand %p815_p9, %p1309_p1  ;;  %p896_p7 = scmp.lt.s32.totalorder %s887_s19, %s887_s19 }
  0x17   : > { %p878_p12 = pneg %p1128_p11  ;;  %p897_p10 = por %p896_p7, %p895_p5 }
  0x19   : > { %p890_p0 = pnand %p888_p13, %p878_p12 }
  0x1b   : > { %p891_p3 = pneg %p890_p0 }
  0x1d   : > { %p898_p9 = pnand %p897_p10, %p891_p3 }
  0x1f   : > { %901 = shalt.err (!%p898_p9)
}
  0x20   : > { %s1028_s20 = smov 128   ;;  %s1029_s21 = smov 8  }
  0x21   : > { %s1319_s1 = sld [smem:[#allocation13_spill]]  ;;  %s913_s24 = scalar_lea.vmem %s258_s18, 2048 }
  0x22   : > { %p914_p1 = scmp.ne.s32.totalorder %s258_s18, %s913_s24  ;;  %p921_p2 = scmp.lt.s32.totalorder %s258_s18, %s258_s18 }
  0x23   : > { %p922_p6 = scmp.lt.s32.totalorder %s913_s24, %s913_s24 }
  0x24   : > { %p916_p13 = pnand %p914_p1, %p878_p12 }
  0x25   : > { %p923_p5 = por %p922_p6, %p921_p2 }
  0x26   : > { %p917_p0 = pneg %p916_p13 }
  0x27   : > { %818 = dma.hbm_to_vmem [thread:$0]  (!%p1128_p11), %s1319_s1, 2048, %s242_s15, [#allocation6], %s1028_s20, %s1028_s20, %s1029_s21  }
  0x28   : > { %p924_p10 = pnand %p923_p5, %p917_p0 }
  0x2a   : > { %927 = shalt.err (!%p924_p10)
}
  0x2b   : > { %s1320_s3 = sld [smem:[#allocation14_spill]]  ;;  %s1151_s10 = sadd.s32 1, %s1024_s30  }
  0x2c   : > { %s32_s14 = sadd.s32 1, %s1020_s29  ;;  %s29_s15 = ssub.s32 %s1024_s30, %s1151_s10 }
  0x2d   : > { %p39_p1 = scmp.ne.s32.totalorder %s1020_s29, %s1016_s28  ;;  %p30_p2 = scmp.eq.s32.totalorder %s29_s15, 0 }
  0x2e   : > { %p40_p6 = scmp.eq.s32.totalorder %s1024_s30, 0  ;;  %p1321_p12 = scmp.eq.s32.totalorder %s1100_s9, 1 }
  0x2f   : > { %p832_p7 = scmp.lt.s32.totalorder %s1024_s30, 2  ;;  %s283_s19 = sand.u32 1, %s1020_s29  }
  0x30   : > { %p1161_p3 = por %p1321_p12, %p39_p1  ;;  %p41_p9 = por %p40_p6, %p39_p1 }
  0x31   : > { %821 = dma.hbm_to_vmem [thread:$0]  (!%p1128_p11), %s1320_s3, 2048, %s258_s18, [#allocation6], %s1028_s20, %s1028_s20, %s1029_s21  }
  0x32   : > { %s1322_s16 = scalar_select %p1161_p3, 1, 0 }
  0x33   : > { %s1167_s17 = scalar_select %p30_p2, %s1020_s29, %s32_s14  }
  0x34   : > { %s683_s22 = sshll.u32 %s283_s19, 3  ;;  %s684_s18 = sshll.u32 %s1024_s30, 7 }
  0x35   : > { %1323 = sst [smem:[#allocation12_spill]] %s1167_s17  ;;  %s1174_s23 = scalar_lea.hbm %s1300_s0, %s684_s18 }
  0x36   : > { %s287_s24 = scalar_lea.vmem [#allocation2], %s683_s22  ;;  %p1176_p11 = pnand %p832_p7, %p41_p9 }
  0x37   : > { %s294_s25 = sshll.u32 %s287_s24, 4  ;;  %s284_s14 = scalar_lea.sflag [#allocation3], %s283_s19  ;;  %s295_s25 = int_to_ptr.vmem [resolvable:$true] %s294_s25 }
  0x38   : > { %s928_s15 = scalar_lea.hbm %s1174_s23, 128  ;;  %p930_p0 = pneg %p1176_p11 }
  0x39   : > { %p929_p13 = scmp.ne.s32.totalorder %s1174_s23, %s928_s15  ;;  %s933_s21 = scalar_lea.hbm %s1300_s0, 256 }
  0x3a   : > { %p934_p1 = scmp.lt.s32.totalorder %s1174_s23, %s1300_s0  ;;  %p935_p2 = scmp.lt.s32.totalorder %s933_s21, %s928_s15 }
  0x3b   : > { %p931_p5 = pnand %p930_p0, %p929_p13 }
  0x3c   : > { %p936_p6 = por %p935_p2, %p934_p1 }
  0x3d   : > { %p932_p10 = pneg %p931_p5 }
  0x3f   : > { %p937_p12 = pnand %p936_p6, %p932_p10 }
  0x41   : > { %940 = shalt.err (!%p937_p12)
}
  0x42   : > { %s941_s24 = scalar_lea.vmem %s295_s25, 128  ;;  %s1030_s19 = smov [#allocation2]  }
  0x43   : > { %p942_p7 = scmp.ne.s32.totalorder %s295_s25, %s941_s24  ;;  %s946_s3 = sshll.u32 %s1030_s19, 4  ;;  %s947_s3 = int_to_ptr.vmem [resolvable:$false] %s946_s3 }
  0x44   : > { %s948_s17 = scalar_lea.vmem %s947_s3, 256  ;;  %p949_p13 = scmp.lt.s32.totalorder %s295_s25, %s947_s3 }
  0x45   : > { %p944_p9 = pnand %p942_p7, %p930_p0  ;;  %p950_p5 = scmp.lt.s32.totalorder %s948_s17, %s941_s24 }
  0x47   : > { %p945_p3 = pneg %p944_p9  ;;  %p951_p4 = por %p950_p5, %p949_p13 }
  0x49   : > { %p952_p8 = pnand %p951_p4, %p945_p3 }
  0x4b   : > { %955 = shalt.err (!%p952_p8)
}
  0x4c   : > { %825 = dma.hbm_to_vmem [thread:$0]  (!%p1176_p11), %s1174_s23, 128, %s295_s25, %s284_s14  }
  0x4d   : > { %p1325_p10 = scmp.ne.s32.totalorder %s1317_s13, 0 }
  0x4e   : > { %s1197_s1 = sand.u32 (!%p1325_p10), 1, %s1016_s28   ;;  %p1326_p4 = scmp.ne.s32.totalorder (!%p1325_p10), %s1315_s11, 0 }
  0x4f   : > { %303 = sbr.rel (%p1325_p10) target bundleno = 837 (0x345), region = 52  ;;  %s686_s15 = sshll.u32 (!%p1325_p10), %s1197_s1, 3 }
  0x50   : > { %s306_s3 = scalar_lea.sflag (!%p1325_p10), [#allocation3], %s1197_s1  ;;  %s1203_s17 = scalar_lea.vmem (!%p1325_p10), [#allocation2], %s686_s15 }
  0x54   : > { %999 = dma.done.wait (%p1326_p4), %s306_s3, 128  }
  0x55   : > { %1001 = vsyncadd (%p1326_p4), %s306_s3, 4294967168  ;;  %p1327_p8 = scmp.eq.s32.totalorder %s1100_s9, 0 }
  0x57   : > { %1003 = dma.done.wait (%p1327_p8), [#allocation6], 4096   ;;  %p1328_p3 = pmov %p1327_p8 }
  0x58   : > { %v1031_v0 = vmov 0.0   ;;  %vm1032_vm0 = vmmov 0   ;;  %v366_v1 = vld [vmem:[#allocation5 + $0x78] sm:$0xff]  ;;  %v365_v2 = vld [vmem:[#allocation5 + $0x70] sm:$0xff]  ;;  %v364_v3 = vld [vmem:[#allocation5 + $0x68] sm:$0xff]  ;;  %s696_s24 = sshll.u32 %s1100_s9, 7 }
  0x59   : > { %1005 = vsyncadd (%p1328_p3), [#allocation6], 4294963200  ;;  %733 = vmatprep.subr.mxu0 %v1031_v0  ;;  %765 = vmatprep.mubr.msk.f32.mxu0 %vm1032_vm0, %v1031_v0  ;;  %v363_v4 = vld [vmem:[#allocation5 + $0x60] sm:$0xff]  ;;  %v460_v5 = vld [vmem:[#allocation7 + $0x78] sm:$0xff]  ;;  %s349_s19 = scalar_lea.vmem [#allocation8], %s686_s15  ;;  %s587_s13 = scalar_lea.hbm %s1308_s8, %s696_s24 }
  0x5a   : > { %768 = vmatprep.subr.mxu1 %v1031_v0  ;;  %800 = vmatprep.mubr.msk.f32.mxu1 %vm1032_vm0, %v1031_v0  ;;  %v362_v6 = vld [vmem:[#allocation5 + $0x58] sm:$0xff]  ;;  %v459_v7 = vld [vmem:[#allocation7 + $0x70] sm:$0xff]  ;;  %v458_v8 = vld [vmem:[#allocation7 + $0x68] sm:$0xff]  ;;  %s589_s3 = sshll.u32 %s349_s19, 4  ;;  %s576_s23 = scalar_lea.sflag [#allocation4], %s1197_s1  ;;  %s590_s3 = int_to_ptr.vmem [resolvable:$true] %s589_s3 }
  0x5b   : > { %734 = vmatpush3.msra.mxu0 %v366_v1  ;;  %769 = vmatpush3.msra.mxu1 %v460_v5  ;;  %v361_v9 = vld [vmem:[#allocation5 + $0x50] sm:$0xff]  ;;  %v457_v10 = vld [vmem:[#allocation7 + $0x60] sm:$0xff]  ;;  %v360_v11 = vld [vmem:[#allocation5 + $0x48] sm:$0xff]  ;;  %s956_s25 = scalar_lea.vmem %s590_s3, 128  ;;  %p1329_p0 = scmp.ne.s32.totalorder %s1322_s16, 0 }
  0x5c   : > { %735 = vmatprep.subr.mxu0 %v1031_v0  ;;  %770 = vmatprep.subr.mxu1 %v1031_v0  ;;  %v456_v12 = vld [vmem:[#allocation7 + $0x58] sm:$0xff]  ;;  %v359_v13 = vld [vmem:[#allocation5 + $0x40] sm:$0xff]  ;;  %v455_v14 = vld [vmem:[#allocation7 + $0x50] sm:$0xff]  ;;  %p957_p11 = scmp.ne.s32.totalorder %s590_s3, %s956_s25  ;;  %s1033_s26 = smov [#allocation8]  }
  0x5d   : > { %736 = vmatpush3.msra.mxu0 %v365_v2  ;;  %771 = vmatpush3.msra.mxu1 %v459_v7  ;;  %v358_v15 = vld [vmem:[#allocation5 + $0x38] sm:$0xff]  ;;  %v454_v16 = vld [vmem:[#allocation7 + $0x48] sm:$0xff]  ;;  %v357_v17 = vld [vmem:[#allocation5 + $0x30] sm:$0xff]  ;;  %s960_s14 = sshll.u32 %s1033_s26, 4  ;;  %s961_s14 = int_to_ptr.vmem [resolvable:$false] %s960_s14 }
  0x5e   : > { %737 = vmatprep.subr.mxu0 %v1031_v0  ;;  %772 = vmatprep.subr.mxu1 %v1031_v0  ;;  %v453_v18 = vld [vmem:[#allocation7 + $0x40] sm:$0xff]  ;;  %v356_v19 = vld [vmem:[#allocation5 + $0x28] sm:$0xff]  ;;  %v452_v20 = vld [vmem:[#allocation7 + $0x38] sm:$0xff]  ;;  %p958_p1 = pnand %p957_p11, %p1329_p0  ;;  %s962_s9 = scalar_lea.vmem %s961_s14, 256 }
  0x5f   : > { %738 = vmatpush3.msra.mxu0 %v364_v3  ;;  %773 = vmatpush3.msra.mxu1 %v458_v8  ;;  %v355_v21 = vld [vmem:[#allocation5 + $0x20] sm:$0xff]  ;;  %v451_v22 = vld [vmem:[#allocation7 + $0x30] sm:$0xff]  ;;  %v354_v23 = vld [vmem:[#allocation5 + $0x18] sm:$0xff]  ;;  %p963_p6 = scmp.lt.s32.totalorder %s590_s3, %s961_s14  ;;  %p964_p12 = scmp.lt.s32.totalorder %s962_s9, %s956_s25 }
  0x60   : > { %739 = vmatprep.subr.mxu0 %v1031_v0  ;;  %774 = vmatprep.subr.mxu1 %v1031_v0  ;;  %v450_v24 = vld [vmem:[#allocation7 + $0x28] sm:$0xff]  ;;  %v353_v25 = vld [vmem:[#allocation5 + $0x10] sm:$0xff]  ;;  %v449_v26 = vld [vmem:[#allocation7 + $0x20] sm:$0xff]  ;;  %p959_p2 = pneg %p958_p1 }
  0x61   : > { %740 = vmatpush3.msra.mxu0 %v363_v4  ;;  %775 = vmatpush3.msra.mxu1 %v457_v10  ;;  %v352_v27 = vld [vmem:[#allocation5 + $0x8] sm:$0xff]  ;;  %v448_v28 = vld [vmem:[#allocation7 + $0x18] sm:$0xff]  ;;  %v351_v29 = vld [vmem:[#allocation5] sm:$0xff]  ;;  %p965_p7 = por %p964_p12, %p963_p6 }
  0x62   : > { %741 = vmatprep.subr.mxu0 %v1031_v0  ;;  %776 = vmatprep.subr.mxu1 %v1031_v0  ;;  %v350_v30 = vld [vmem:[%s1203_s17] sm:$0xff]  ;;  %v446_v32 = vld [vmem:[#allocation7 + $0x8] sm:$0xff]  ;;  %v445_v33 = vld [vmem:[#allocation7] sm:$0xff] }
  0x63   : > { %742 = vmatpush3.msra.mxu0 %v362_v6  ;;  %777 = vmatpush3.msra.mxu1 %v456_v12  ;;  %v447_v31 = vld [vmem:[#allocation7 + $0x10] sm:$0xff]  ;;  %p966_p9 = pnand %p965_p7, %p959_p2 }
  0x64   : > { %743 = vmatprep.subr.mxu0 %v1031_v0  ;;  %778 = vmatprep.subr.mxu1 %v1031_v0  ;;  %v690_v34 = vld [vmem:[%s1302_s2] ss:$0 sm:$0xff] }
  0x65   : > { %744 = vmatpush3.msra.mxu0 %v361_v9  ;;  %779 = vmatpush3.msra.mxu1 %v455_v14  ;;  %v691_v39 = vld [vmem:[%s1304_s4] ss:$0 sm:$0xff] }
  0x66   : > { %745 = vmatprep.subr.mxu0 %v1031_v0  ;;  %780 = vmatprep.subr.mxu1 %v1031_v0  ;;  %v692_v46 = vld [vmem:[%s1307_s7] ss:$0 sm:$0xff] }
  0x67   : > { %746 = vmatpush3.msra.mxu0 %v360_v11  ;;  %781 = vmatpush3.msra.mxu1 %v454_v16  ;;  %v693_v54 = vld [vmem:[%s1305_s5] ss:$0 sm:$0xff] }
  0x68   : > { %747 = vmatprep.subr.mxu0 %v1031_v0  ;;  %782 = vmatprep.subr.mxu1 %v1031_v0  ;;  %v694_v56 = vld [vmem:[%s1306_s6] ss:$0 sm:$0xff] }
  0x69   : > { %748 = vmatpush3.msra.mxu0 %v359_v13  ;;  %783 = vmatpush3.msra.mxu1 %v453_v18 }
  0x6a   : > { %749 = vmatprep.subr.mxu0 %v1031_v0  ;;  %784 = vmatprep.subr.mxu1 %v1031_v0 }
  0x6b   : > { %750 = vmatpush3.msra.mxu0 %v358_v15  ;;  %785 = vmatpush3.msra.mxu1 %v452_v20 }
  0x6c   : > { %751 = vmatprep.subr.mxu0 %v1031_v0  ;;  %786 = vmatprep.subr.mxu1 %v1031_v0 }
  0x6d   : > { %752 = vmatpush3.msra.mxu0 %v357_v17  ;;  %787 = vmatpush3.msra.mxu1 %v451_v22 }
  0x6e   : > { %753 = vmatprep.subr.mxu0 %v1031_v0  ;;  %788 = vmatprep.subr.mxu1 %v1031_v0 }
  0x6f   : > { %754 = vmatpush3.msra.mxu0 %v356_v19  ;;  %789 = vmatpush3.msra.mxu1 %v450_v24 }
  0x70   : > { %755 = vmatprep.subr.mxu0 %v1031_v0  ;;  %790 = vmatprep.subr.mxu1 %v1031_v0 }
  0x71   : > { %756 = vmatpush3.msra.mxu0 %v355_v21  ;;  %791 = vmatpush3.msra.mxu1 %v449_v26 }
  0x72   : > { %757 = vmatprep.subr.mxu0 %v1031_v0  ;;  %792 = vmatprep.subr.mxu1 %v1031_v0 }
  0x73   : > { %758 = vmatpush3.msra.mxu0 %v354_v23  ;;  %793 = vmatpush3.msra.mxu1 %v448_v28 }
  0x74   : > { %759 = vmatprep.subr.mxu0 %v1031_v0  ;;  %794 = vmatprep.subr.mxu1 %v1031_v0 }
  0x75   : > { %760 = vmatpush3.msra.mxu0 %v353_v25  ;;  %795 = vmatpush3.msra.mxu1 %v447_v31 }
  0x76   : > { %761 = vmatprep.subr.mxu0 %v1031_v0  ;;  %796 = vmatprep.subr.mxu1 %v1031_v0 }
  0x77   : > { %762 = vmatpush3.msra.mxu0 %v352_v27  ;;  %797 = vmatpush3.msra.mxu1 %v446_v32 }
  0x78   : > { %763 = vmatprep.subr.mxu0 %v1031_v0  ;;  %798 = vmatprep.subr.mxu1 %v1031_v0 }
  0x79   : > { %764 = vmatpush3.msra.mxu0 %v351_v29  ;;  %799 = vmatpush3.msra.mxu1 %v445_v33 }
  0x7a   : > { %766 = vmatmul.mubr.f32.vlgmr.msra.gmra.mxu0 %v350_v30 }
 0x13a   : > { %v440_v35 = vpop.f32.mrf.mxu0 }
 0x13b   : > { %v441_v36 = vadd.f32 %v690_v34, %v440_v35 }
 0x13c   : > { %v767_v37 = vpop.f32.mrf.mxu0 }
 0x13d   : > { %v444_v38 = vmax.f32 %v441_v36, 0.0 }
 0x13f   : > { %801 = vmatmul.mubr.f32.vlgmr.msra.gmra.mxu1 %v444_v38 }
 0x1ff   : > { %v534_v40 = vpop.f32.mrf.mxu1 }
 0x200   : > { %v535_v41 = vadd.f32 %v691_v39, %v534_v40 }
 0x201   : > { %v802_v42 = vpop.f32.mrf.mxu1 }
 0x202   : > { %v538_v43 = vadd.f32 %v535_v41, %v350_v30 }
 0x204   : > { %539 = vadd.xlane.f32.xlu0 %v538_v43 }
 0x28d   : > { %v540_v44 = vpop.xlane.xlu0 %539 }
 0x28e   : > { %v541_v45 = vmul.f32 0.03125, %v540_v44 }
 0x290   : > { %v542_v47 = vsub.f32 %v538_v43, %v541_v45 }
 0x292   : > { %v550_v48 = vmul.f32 %v692_v46, %v542_v47 }
 0x294   : > { %v551_v49 = vmul.f32 %v550_v48, %v550_v48 }
 0x296   : > { %552 = vadd.xlane.f32.xlu0 %v551_v49 }
 0x31f   : > { %v553_v50 = vpop.xlane.xlu0 %552 }
 0x320   : > { %v554_v51 = vmul.f32 0.03125, %v553_v50 }
 0x322   : > { %v555_v52 = vadd.f32 1e-05, %v554_v51 }
 0x324   : > { %874 = vrsqrt.f32 %v555_v52 }
 0x331   : > { %v875_v53 = vpop.eup %874 }
 0x332   : > { %v557_v55 = vmul.f32 %v875_v53, %v542_v47 }
 0x334   : > { %v565_v57 = vmul.f32 %v693_v54, %v557_v55 }
 0x336   : > { %v573_v58 = vadd.f32 %v694_v56, %v565_v57 }
 0x338   : > { %574 = vst [vmem:[%s349_s19] sm:$0xff] %v573_v58 }
 0x339   : > { %969 = shalt.err (!%p966_p9)
}
 0x33a   : > { %s970_s15 = scalar_lea.hbm %s587_s13, 128  ;;  %s974_s20 = scalar_lea.hbm %s1308_s8, 256 }
 0x33b   : > { %p971_p13 = scmp.ne.s32.totalorder %s587_s13, %s970_s15  ;;  %p975_p4 = scmp.lt.s32.totalorder %s587_s13, %s1308_s8 }
 0x33c   : > { %p976_p8 = scmp.lt.s32.totalorder %s974_s20, %s970_s15 }
 0x33d   : > { %p972_p5 = pnand %p971_p13, %p1329_p0 }
 0x33e   : > { %p977_p3 = por %p976_p8, %p975_p4 }
 0x33f   : > { %p973_p10 = pneg %p972_p5 }
 0x341   : > { %p978_p11 = pnand %p977_p3, %p973_p10 }
 0x343   : > { %981 = shalt.err (!%p978_p11)
}
 0x344   : > { %813 = dma.vmem_to_hbm [thread:$0]  (%p1329_p0), %s590_s3, 128, %s587_s13, %s576_s23  }
 0x345 PF: > { %s601_s24 = sand.u32 1, %s1012_s27   ;;  %p1330_p1 = scmp.ne.s32.totalorder %s1316_s12, 0 }
 0x346   : > { %p1331_p2 = scmp.ge.s32.totalorder %s1024_s30, 2  ;;  %s602_s19 = scalar_lea.sflag [#allocation4], %s601_s24 }
 0x348   : > { %p827_p6 = pnand %p1331_p2, %p1330_p1 }
 0x34a   : > { %p828_p12 = pneg %p827_p6 }
 0x34c   : > { %1007 = dma.done.wait (%p828_p12), %s602_s19, 128  }
 0x34d   : > { %1009 = vsyncadd (%p828_p12), %s602_s19, 4294967168  ;;  %s1332_s17 = sld [smem:[#allocation12_spill]]  ;;  %p22_p7 = scmp.ge.s32.totalorder %s1151_s10, 4  }
 0x34e   : > { %s1333_s27 = smov %s1016_s28  ;;  %s1334_s28 = smov %s1020_s29 }
 0x34f   : > { %s1336_s30 = smov %s1151_s10  ;;  %24 = sbr.rel (!%p22_p7) target bundleno = 9 (0x9), region = 105 }
 0x353   : > { %s1335_s29 = smov %s1332_s17 }
 0x354   :  { %607 = vsyncpa [#allocation3], 1 }
 0x355   :  { %609 = vsyncpa [#allocation3 + $0x1], 1 }
 0x356   :  { %610 = vsyncpa [#allocation6], 1 }
 0x357   :  { %611 = vsyncpa [#allocation4], 1 }
 0x358   :  { %613 = vsyncpa [#allocation4 + $0x1], 1 }

</bundles_post_ra>
